<compile_context>
chip_gen: v5e
topology: v5e:2x2
jax: 0.10.0
libtpu: 0.0.40
codegen_flags: <defaults>
</compile_context>

<pallas_src>
import jax
import jax.numpy as jnp
from jax.experimental import pallas as pl
from jax.experimental.pallas import tpu as pltpu


def _fc_kernel(x_ref,
               w1_ref, b1_ref,
               w2_ref, b2_ref,
               w3_ref, b3_ref,
               w4_ref, b4_ref,
               o_ref):
    """Whole MLP hot path for one batch tile: 4 matmuls + ReLU + sigmoid."""
    x = x_ref[...]                                                     # [TB, 512] compute_dtype

    w1 = w1_ref[...]
    h = jnp.dot(x, w1, preferred_element_type=jnp.float32) + b1_ref[...]
    h = jnp.maximum(h, 0.0)                                            # [TB, 64] f32

    w2 = w2_ref[...]
    h = jnp.dot(h.astype(w2.dtype), w2, preferred_element_type=jnp.float32) + b2_ref[...]
    h = jnp.maximum(h, 0.0)                                            # [TB, 16]

    w3 = w3_ref[...]
    h = jnp.dot(h.astype(w3.dtype), w3, preferred_element_type=jnp.float32) + b3_ref[...]
    h = jnp.maximum(h, 0.0)                                            # [TB, 4]

    w4 = w4_ref[...]
    z = jnp.dot(h.astype(w4.dtype), w4, preferred_element_type=jnp.float32) + b4_ref[...]
    o_ref[...] = jax.nn.sigmoid(z).astype(o_ref.dtype)                 # [TB, 2]


def _round_up(n, m):
    return ((n + m - 1) // m) * m


# Budget for the double-buffered x tile. 8 MiB keeps us inside v5e's 16 MiB
# default scoped VMEM (with weights/output/intermediates on top) and leaves
# headroom on v7x's 64 MiB physical VMEM, while being large enough to amortize
# the ~0.35 us per-grid-step overhead on v6e/v7x.
_X_TILE_BUDGET_BYTES = 8 << 20


def _choose_tb(b, d_in, itemsize):
    """Batch tile: multiple of 8, VMEM-budget capped, >=2 tiles for medium batches
    so v7x's two TensorCores both get work on the "parallel" grid axis."""
    tb_max = max(8, (_X_TILE_BUDGET_BYTES // (2 * d_in * itemsize)) // 8 * 8)
    b8 = _round_up(b, 8)
    if b8 <= 1024:                 # small batch: one tile (overhead is negligible anyway)
        return min(b8, tb_max)
    if b8 <= 2 * tb_max:           # medium batch: split so the grid has >=2 steps
        return _round_up(pl.cdiv(b8, 2), 8)
    return tb_max                  # large batch: many steps at max tile size


def full_connect_forward(x, params, compute_dtype=jnp.bfloat16, tb=None):
    """x: any shape [B, ...] whose trailing dims flatten to input_dim (512).

    compute_dtype: dtype fed to the MXU for x / weights (accumulation is always
      f32). bf16 (default) halves the dominant HBM read; pass jnp.float32 for an
      exact-f32 parity check.
    tb: optional batch-tile override (rows per grid step, multiple of 8).
    """
    b = x.shape[0]
    x2d = x.reshape(b, -1).astype(compute_dtype)                       # torch .view(B, -1)
    d_in = x2d.shape[1]

    wbs = [(w.astype(compute_dtype), bias.astype(jnp.float32)) for (w, bias) in params]
    (w1, b1), (w2, b2), (w3, b3), (w4, b4) = wbs
    out_dim = w4.shape[1]

    itemsize = jnp.dtype(compute_dtype).itemsize
    if tb is None:
        tb = _choose_tb(b, d_in, itemsize)

    # Partial last block (when tb does not divide B): out-of-bounds rows read
    # unspecified values and out-of-bounds output rows are discarded. Rows are
    # fully independent, so this is safe and avoids any padding copy of x.
    grid = (pl.cdiv(b, tb),)

    const = lambda i: (0, 0)   # weights/biases: same block every step -> stay VMEM-resident

    layer_dims = [(w.shape[0], w.shape[1]) for (w, _) in wbs]
    w_bytes = sum(w.size * w.dtype.itemsize + bias.size * bias.dtype.itemsize
                  for (w, bias) in wbs)
    cost = pl.CostEstimate(
        flops=2 * b * sum(din * dout for din, dout in layer_dims),
        transcendentals=b * out_dim,                                   # sigmoid exp
        bytes_accessed=b * (d_in * itemsize + out_dim * 4) + w_bytes,
    )

    out = pl.pallas_call(
        _fc_kernel,
        out_shape=jax.ShapeDtypeStruct((b, out_dim), jnp.float32),
        grid=grid,
        in_specs=[
            pl.BlockSpec((tb, d_in), lambda i: (i, 0)),                # x: tiled over batch, double-buffered DMA
            pl.BlockSpec(w1.shape, const), pl.BlockSpec(b1.shape, const),
            pl.BlockSpec(w2.shape, const), pl.BlockSpec(b2.shape, const),
            pl.BlockSpec(w3.shape, const), pl.BlockSpec(b3.shape, const),
            pl.BlockSpec(w4.shape, const), pl.BlockSpec(b4.shape, const),
        ],
        out_specs=pl.BlockSpec((tb, out_dim), lambda i: (i, 0)),
        compiler_params=pltpu.CompilerParams(
            dimension_semantics=("parallel",),                         # megacore sharding on v7x
        ),
        cost_estimate=cost,
    )(x2d, w1, b1, w2, b2, w3, b3, w4, b4)

    return out


def init_params(key, input_dim=512, output_dim=2):
    """Deterministic parameter init matching the nn.Linear shapes.
    Weights stored as [in, out]; biases as [1, out] (2-D for TPU layout)."""
    dims = [(input_dim, 64), (64, 16), (16, 4), (4, output_dim)]
    params = []
    for i, (din, dout) in enumerate(dims):
        kw, kb = jax.random.split(jax.random.fold_in(key, i))
        bound = 1.0 / (din ** 0.5)   # PyTorch default uniform(-1/sqrt(fan_in), +)
        w = jax.random.uniform(kw, (din, dout), jnp.float32, -bound, bound)
        bias = jax.random.uniform(kb, (1, dout), jnp.float32, -bound, bound)
        params.append((w, bias))
    return params


def _reference_forward(x, params):
    h = x.reshape(x.shape[0], -1).astype(jnp.float32)
    (w1, b1), (w2, b2), (w3, b3), (w4, b4) = params
    h = jnp.maximum(h @ w1 + b1, 0.0)
    h = jnp.maximum(h @ w2 + b2, 0.0)
    h = jnp.maximum(h @ w3 + b3, 0.0)
    return jax.nn.sigmoid(h @ w4 + b4)


if __name__ == "__main__":
    key = jax.random.PRNGKey(0)
    k_x, k_p = jax.random.split(key)

    # NCHW input whose flatten == input_dim: 2 * 16 * 16 = 512
    x = jax.random.normal(k_x, (2, 2, 16, 16), dtype=jnp.float32)
    params = init_params(k_p, input_dim=512, output_dim=2)
    ref = _reference_forward(x, params)

    # Exact-structure check: f32 compute path, tight tolerance.
    out_f32 = jax.block_until_ready(
        full_connect_forward(x, params, compute_dtype=jnp.float32))
    assert out_f32.shape == (2, 2), out_f32.shape
    assert jnp.allclose(out_f32, ref, atol=1e-5, rtol=1e-5)

    # Perf path: bf16 x/weights with f32 accumulation. Looser tolerance accounts
    # for bf16 input quantization; sigmoid outputs lie in [0, 1] so atol is apt.
    out_bf16 = jax.block_until_ready(full_connect_forward(x, params))
    assert out_bf16.shape == (2, 2), out_bf16.shape
    assert jnp.allclose(out_bf16, ref, atol=2e-2)

    # Ragged, multi-tile batch exercising the partial-last-block path
    # (B=37 with tb=16 -> grid of 3, last block has only 5 valid rows).
    x_big = jax.random.normal(jax.random.fold_in(k_x, 1), (37, 2, 16, 16),
                              dtype=jnp.float32)
    ref_big = _reference_forward(x_big, params)
    out_big = jax.block_until_ready(full_connect_forward(x_big, params, tb=16))
    assert out_big.shape == (37, 2), out_big.shape
    assert jnp.allclose(out_big, ref_big, atol=2e-2)

    print("KERNEL_OK")
</pallas_src>

<mosaic_0001>
module attributes {stable_mosaic.version = 11 : i64} {
  func.func @_fc_kernel(%arg0: i32, %arg1: memref<8x512xf32, #tpu.memory_space<vmem>>, %arg2: memref<512x64xf32, #tpu.memory_space<vmem>>, %arg3: memref<1x64xf32, #tpu.memory_space<vmem>>, %arg4: memref<64x16xf32, #tpu.memory_space<vmem>>, %arg5: memref<1x16xf32, #tpu.memory_space<vmem>>, %arg6: memref<16x4xf32, #tpu.memory_space<vmem>>, %arg7: memref<1x4xf32, #tpu.memory_space<vmem>>, %arg8: memref<4x2xf32, #tpu.memory_space<vmem>>, %arg9: memref<1x2xf32, #tpu.memory_space<vmem>>, %arg10: memref<8x2xf32, #tpu.memory_space<vmem>>) attributes {dimension_semantics = [#tpu.dimension_semantics<parallel>], iteration_bounds = array<i64: 1>, scalar_prefetch = 0 : i64, scratch_operands = 0 : i64, tpu.core_type = #tpu.core_type<tc>, window_params = [{transform_indices = @transform_0, window_bounds = array<i64: 8, 512>}, {pipeline_mode = #tpu.pipeline_mode<synchronous>, transform_indices = @transform_1, window_bounds = array<i64: 512, 64>}, {pipeline_mode = #tpu.pipeline_mode<synchronous>, transform_indices = @transform_2, window_bounds = array<i64: 1, 64>}, {pipeline_mode = #tpu.pipeline_mode<synchronous>, transform_indices = @transform_3, window_bounds = array<i64: 64, 16>}, {pipeline_mode = #tpu.pipeline_mode<synchronous>, transform_indices = @transform_4, window_bounds = array<i64: 1, 16>}, {pipeline_mode = #tpu.pipeline_mode<synchronous>, transform_indices = @transform_5, window_bounds = array<i64: 16, 4>}, {pipeline_mode = #tpu.pipeline_mode<synchronous>, transform_indices = @transform_6, window_bounds = array<i64: 1, 4>}, {pipeline_mode = #tpu.pipeline_mode<synchronous>, transform_indices = @transform_7, window_bounds = array<i64: 4, 2>}, {pipeline_mode = #tpu.pipeline_mode<synchronous>, transform_indices = @transform_8, window_bounds = array<i64: 1, 2>}, {transform_indices = @transform_9, window_bounds = array<i64: 8, 2>}]} {
    %c0 = arith.constant 0 : index
    %c0_0 = arith.constant 0 : index
    %0 = vector.load %arg1[%c0, %c0_0] : memref<8x512xf32, #tpu.memory_space<vmem>>, vector<8x512xf32>
    %c0_1 = arith.constant 0 : index
    %c0_2 = arith.constant 0 : index
    %1 = vector.load %arg2[%c0_1, %c0_2] : memref<512x64xf32, #tpu.memory_space<vmem>>, vector<512x64xf32>
    %cst = arith.constant dense<0.000000e+00> : vector<8x64xf32>
    %2 = tpu.matmul %0, %1, %cst {dimension_numbers = #tpu.dot_dimension_numbers<[1], [0], [0], [1], [0, 0, 1, 1], [], []>} : vector<8x512xf32>, vector<512x64xf32>, vector<8x64xf32> -> vector<8x64xf32>
    %c0_3 = arith.constant 0 : index
    %c0_4 = arith.constant 0 : index
    %3 = vector.load %arg3[%c0_3, %c0_4] : memref<1x64xf32, #tpu.memory_space<vmem>>, vector<1x64xf32>
    %4 = vector.broadcast %3 : vector<1x64xf32> to vector<8x64xf32>
    %5 = arith.addf %2, %4 : vector<8x64xf32>
    %cst_5 = arith.constant 0.000000e+00 : f32
    %6 = vector.broadcast %cst_5 : f32 to vector<8x64xf32>
    %7 = arith.maximumf %5, %6 : vector<8x64xf32>
    %c0_6 = arith.constant 0 : index
    %c0_7 = arith.constant 0 : index
    %8 = vector.load %arg4[%c0_6, %c0_7] : memref<64x16xf32, #tpu.memory_space<vmem>>, vector<64x16xf32>
    %cst_8 = arith.constant dense<0.000000e+00> : vector<8x16xf32>
    %9 = tpu.matmul %7, %8, %cst_8 {dimension_numbers = #tpu.dot_dimension_numbers<[1], [0], [0], [1], [0, 0, 1, 1], [], []>} : vector<8x64xf32>, vector<64x16xf32>, vector<8x16xf32> -> vector<8x16xf32>
    %c0_9 = arith.constant 0 : index
    %c0_10 = arith.constant 0 : index
    %10 = vector.load %arg5[%c0_9, %c0_10] : memref<1x16xf32, #tpu.memory_space<vmem>>, vector<1x16xf32>
    %11 = vector.broadcast %10 : vector<1x16xf32> to vector<8x16xf32>
    %12 = arith.addf %9, %11 : vector<8x16xf32>
    %cst_11 = arith.constant 0.000000e+00 : f32
    %13 = vector.broadcast %cst_11 : f32 to vector<8x16xf32>
    %14 = arith.maximumf %12, %13 : vector<8x16xf32>
    %c0_12 = arith.constant 0 : index
    %c0_13 = arith.constant 0 : index
    %15 = vector.load %arg6[%c0_12, %c0_13] : memref<16x4xf32, #tpu.memory_space<vmem>>, vector<16x4xf32>
    %cst_14 = arith.constant dense<0.000000e+00> : vector<8x4xf32>
    %16 = tpu.matmul %14, %15, %cst_14 {dimension_numbers = #tpu.dot_dimension_numbers<[1], [0], [0], [1], [0, 0, 1, 1], [], []>} : vector<8x16xf32>, vector<16x4xf32>, vector<8x4xf32> -> vector<8x4xf32>
    %c0_15 = arith.constant 0 : index
    %c0_16 = arith.constant 0 : index
    %17 = vector.load %arg7[%c0_15, %c0_16] : memref<1x4xf32, #tpu.memory_space<vmem>>, vector<1x4xf32>
    %18 = vector.broadcast %17 : vector<1x4xf32> to vector<8x4xf32>
    %19 = arith.addf %16, %18 : vector<8x4xf32>
    %cst_17 = arith.constant 0.000000e+00 : f32
    %20 = vector.broadcast %cst_17 : f32 to vector<8x4xf32>
    %21 = arith.maximumf %19, %20 : vector<8x4xf32>
    %c0_18 = arith.constant 0 : index
    %c0_19 = arith.constant 0 : index
    %22 = vector.load %arg8[%c0_18, %c0_19] : memref<4x2xf32, #tpu.memory_space<vmem>>, vector<4x2xf32>
    %cst_20 = arith.constant dense<0.000000e+00> : vector<8x2xf32>
    %23 = tpu.matmul %21, %22, %cst_20 {dimension_numbers = #tpu.dot_dimension_numbers<[1], [0], [0], [1], [0, 0, 1, 1], [], []>} : vector<8x4xf32>, vector<4x2xf32>, vector<8x2xf32> -> vector<8x2xf32>
    %c0_21 = arith.constant 0 : index
    %c0_22 = arith.constant 0 : index
    %24 = vector.load %arg9[%c0_21, %c0_22] : memref<1x2xf32, #tpu.memory_space<vmem>>, vector<1x2xf32>
    %25 = vector.broadcast %24 : vector<1x2xf32> to vector<8x2xf32>
    %26 = arith.addf %23, %25 : vector<8x2xf32>
    %27 = arith.negf %26 : vector<8x2xf32>
    %28 = math.exp %27 : vector<8x2xf32>
    %cst_23 = arith.constant 1.000000e+00 : f32
    %29 = vector.broadcast %cst_23 : f32 to vector<8x2xf32>
    %30 = arith.addf %29, %28 : vector<8x2xf32>
    %31 = arith.divf %29, %30 : vector<8x2xf32>
    %c0_24 = arith.constant 0 : index
    %c0_25 = arith.constant 0 : index
    %32 = vector.load %arg10[%c0_24, %c0_25] : memref<8x2xf32, #tpu.memory_space<vmem>>, vector<8x2xf32>
    tpu.vector_store %arg10[%c0_24, %c0_25], %31 {strides = array<i32>} : memref<8x2xf32, #tpu.memory_space<vmem>>, vector<8x2xf32>,
    return
  }
  func.func @transform_0(%arg0: i32) -> (i32, i32) {
    %c0_i32 = arith.constant 0 : i32
    %c0_i32_0 = arith.constant 0 : i32
    return %arg0, %c0_i32 : i32, i32
  }
  func.func @transform_1(%arg0: i32) -> (i32, i32) {
    %c0_i32 = arith.constant 0 : i32
    %c0_i32_0 = arith.constant 0 : i32
    %c0_i32_1 = arith.constant 0 : i32
    return %c0_i32, %c0_i32_0 : i32, i32
  }
  func.func @transform_2(%arg0: i32) -> (i32, i32) {
    %c0_i32 = arith.constant 0 : i32
    %c0_i32_0 = arith.constant 0 : i32
    %c0_i32_1 = arith.constant 0 : i32
    return %c0_i32, %c0_i32_0 : i32, i32
  }
  func.func @transform_3(%arg0: i32) -> (i32, i32) {
    %c0_i32 = arith.constant 0 : i32
    %c0_i32_0 = arith.constant 0 : i32
    %c0_i32_1 = arith.constant 0 : i32
    return %c0_i32, %c0_i32_0 : i32, i32
  }
  func.func @transform_4(%arg0: i32) -> (i32, i32) {
    %c0_i32 = arith.constant 0 : i32
    %c0_i32_0 = arith.constant 0 : i32
    %c0_i32_1 = arith.constant 0 : i32
    return %c0_i32, %c0_i32_0 : i32, i32
  }
  func.func @transform_5(%arg0: i32) -> (i32, i32) {
    %c0_i32 = arith.constant 0 : i32
    %c0_i32_0 = arith.constant 0 : i32
    %c0_i32_1 = arith.constant 0 : i32
    return %c0_i32, %c0_i32_0 : i32, i32
  }
  func.func @transform_6(%arg0: i32) -> (i32, i32) {
    %c0_i32 = arith.constant 0 : i32
    %c0_i32_0 = arith.constant 0 : i32
    %c0_i32_1 = arith.constant 0 : i32
    return %c0_i32, %c0_i32_0 : i32, i32
  }
  func.func @transform_7(%arg0: i32) -> (i32, i32) {
    %c0_i32 = arith.constant 0 : i32
    %c0_i32_0 = arith.constant 0 : i32
    %c0_i32_1 = arith.constant 0 : i32
    return %c0_i32, %c0_i32_0 : i32, i32
  }
  func.func @transform_8(%arg0: i32) -> (i32, i32) {
    %c0_i32 = arith.constant 0 : i32
    %c0_i32_0 = arith.constant 0 : i32
    %c0_i32_1 = arith.constant 0 : i32
    return %c0_i32, %c0_i32_0 : i32, i32
  }
  func.func @transform_9(%arg0: i32) -> (i32, i32) {
    %c0_i32 = arith.constant 0 : i32
    %c0_i32_0 = arith.constant 0 : i32
    return %arg0, %c0_i32 : i32, i32
  }
}

</mosaic_0001>

<bundles_post_ra>
// kernel: tpu_custom_call.1
= control target key start
LH: loop header
LB: loop body
LE: loop exit
PB: predicated region body
PF: predicated region fallthrough
CT: control target
= control target key end

     0   :  { %s692_s0 = inlined_call_operand.vmem [shape: f32[2,512], index: 0, kind: input, shape index: {}]   ;;  %s693_s1 = inlined_call_operand.vmem [shape: f32[512,64], index: 1, kind: input, shape index: {}]   ;;  %s694_s2 = inlined_call_operand.vmem [shape: f32[1,64], index: 2, kind: input, shape index: {}]   ;;  %s695_s3 = inlined_call_operand.vmem [shape: f32[64,16], index: 3, kind: input, shape index: {}]   ;;  %s696_s4 = inlined_call_operand.vmem [shape: f32[1,16], index: 4, kind: input, shape index: {}]   ;;  %s697_s5 = inlined_call_operand.vmem [shape: f32[16,4], index: 5, kind: input, shape index: {}]   ;;  %s698_s6 = inlined_call_operand.vmem [shape: f32[1,4], index: 6, kind: input, shape index: {}]   ;;  %s699_s7 = inlined_call_operand.vmem [shape: f32[4,2], index: 7, kind: input, shape index: {}]   ;;  %s700_s8 = inlined_call_operand.vmem [shape: f32[1,2], index: 8, kind: input, shape index: {}]   ;;  %s701_s9 = inlined_call_operand.hbm [shape: f32[2,2], index: 9, kind: output, shape index: {}]  }
   0x1   :  { %v84_v0 = vld [vmem:[%s693_s1 + $0x178] sm:$0xff] }
   0x2   :  { %14 = vsyncpa [#allocation3], 0  ;;  %v52_v1 = vld [vmem:[%s693_s1 + $0x78] sm:$0xff]  ;;  %164 = vmatpush.msra.mxu2 %v84_v0  ;;  %v83_v2 = vld [vmem:[%s693_s1 + $0x170] sm:$0xff]  ;;  %vm217_vm0 = vcmask 523264   ;;  %vm282_vm1 = vcmask 1043456  }
   0x3   :  { %124 = vmatpush.msra.mxu0 %v52_v1  ;;  %v100_v3 = vld [vmem:[%s693_s1 + $0x1f8] sm:$0xff]  ;;  %v51_v4 = vld [vmem:[%s693_s1 + $0x70] sm:$0xff]  ;;  %v82_v6 = vld [vmem:[%s693_s1 + $0x168] sm:$0xff]  ;;  %vm248_vm2 = vcmask 130048   ;;  %vm278_vm3 = vcmask 31744   ;;  %vm325_vm7 = vcmask 15360  }
   0x4   :  { %184 = vmatpush.msra.mxu3 %v100_v3  ;;  %v68_v5 = vld [vmem:[%s693_s1 + $0xf8] sm:$0xff]  ;;  %v99_v7 = vld [vmem:[%s693_s1 + $0x1f0] sm:$0xff]  ;;  %165 = vmatpush.msra.mxu2 %v83_v2  ;;  %v50_v8 = vld [vmem:[%s693_s1 + $0x68] sm:$0xff] }
   0x5   :  { %125 = vmatpush.msra.mxu0 %v51_v4  ;;  %v67_v9 = vld [vmem:[%s693_s1 + $0xf0] sm:$0xff]  ;;  %144 = vmatpush.msra.mxu1 %v68_v5  ;;  %v81_v10 = vld [vmem:[%s693_s1 + $0x160] sm:$0xff]  ;;  %v98_v11 = vld [vmem:[%s693_s1 + $0x1e8] sm:$0xff] }
   0x6   :  { %185 = vmatpush.msra.mxu3 %v99_v7  ;;  %v49_v12 = vld [vmem:[%s693_s1 + $0x60] sm:$0xff]  ;;  %166 = vmatpush.msra.mxu2 %v82_v6  ;;  %v66_v13 = vld [vmem:[%s693_s1 + $0xe8] sm:$0xff]  ;;  %v80_v15 = vld [vmem:[%s693_s1 + $0x158] sm:$0xff] }
   0x7   :  { %126 = vmatpush.msra.mxu0 %v50_v8  ;;  %v97_v14 = vld [vmem:[%s693_s1 + $0x1e0] sm:$0xff]  ;;  %145 = vmatpush.msra.mxu1 %v67_v9  ;;  %v48_v16 = vld [vmem:[%s693_s1 + $0x58] sm:$0xff]  ;;  %v79_v19 = vld [vmem:[%s693_s1 + $0x150] sm:$0xff] }
   0x8   :  { %186 = vmatpush.msra.mxu3 %v98_v11  ;;  %167 = vmatpush.msra.mxu2 %v81_v10  ;;  %v65_v17 = vld [vmem:[%s693_s1 + $0xe0] sm:$0xff]  ;;  %v96_v18 = vld [vmem:[%s693_s1 + $0x1d8] sm:$0xff]  ;;  %v47_v20 = vld [vmem:[%s693_s1 + $0x50] sm:$0xff] }
   0x9   :  { %127 = vmatpush.msra.mxu0 %v49_v12  ;;  %146 = vmatpush.msra.mxu1 %v66_v13  ;;  %v64_v21 = vld [vmem:[%s693_s1 + $0xd8] sm:$0xff]  ;;  %v95_v22 = vld [vmem:[%s693_s1 + $0x1d0] sm:$0xff]  ;;  %v78_v23 = vld [vmem:[%s693_s1 + $0x148] sm:$0xff] }
   0xa   :  { %187 = vmatpush.msra.mxu3 %v97_v14  ;;  %168 = vmatpush.msra.mxu2 %v80_v15  ;;  %v46_v24 = vld [vmem:[%s693_s1 + $0x48] sm:$0xff]  ;;  %v63_v25 = vld [vmem:[%s693_s1 + $0xd0] sm:$0xff]  ;;  %v77_v27 = vld [vmem:[%s693_s1 + $0x140] sm:$0xff] }
   0xb   :  { %128 = vmatpush.msra.mxu0 %v48_v16  ;;  %147 = vmatpush.msra.mxu1 %v65_v17  ;;  %v94_v26 = vld [vmem:[%s693_s1 + $0x1c8] sm:$0xff]  ;;  %v45_v28 = vld [vmem:[%s693_s1 + $0x40] sm:$0xff]  ;;  %v76_v31 = vld [vmem:[%s693_s1 + $0x138] sm:$0xff] }
   0xc   :  { %188 = vmatpush.msra.mxu3 %v96_v18  ;;  %169 = vmatpush.msra.mxu2 %v79_v19  ;;  %v62_v29 = vld [vmem:[%s693_s1 + $0xc8] sm:$0xff]  ;;  %v93_v30 = vld [vmem:[%s693_s1 + $0x1c0] sm:$0xff]  ;;  %v44_v32 = vld [vmem:[%s693_s1 + $0x38] sm:$0xff] }
   0xd   :  { %129 = vmatpush.msra.mxu0 %v47_v20  ;;  %148 = vmatpush.msra.mxu1 %v64_v21  ;;  %v61_v33 = vld [vmem:[%s693_s1 + $0xc0] sm:$0xff]  ;;  %v92_v34 = vld [vmem:[%s693_s1 + $0x1b8] sm:$0xff]  ;;  %v75_v35 = vld [vmem:[%s693_s1 + $0x130] sm:$0xff] }
   0xe   :  { %189 = vmatpush.msra.mxu3 %v95_v22  ;;  %170 = vmatpush.msra.mxu2 %v78_v23  ;;  %v43_v36 = vld [vmem:[%s693_s1 + $0x30] sm:$0xff]  ;;  %v60_v37 = vld [vmem:[%s693_s1 + $0xb8] sm:$0xff]  ;;  %v74_v39 = vld [vmem:[%s693_s1 + $0x128] sm:$0xff] }
   0xf   :  { %130 = vmatpush.msra.mxu0 %v46_v24  ;;  %149 = vmatpush.msra.mxu1 %v63_v25  ;;  %v91_v38 = vld [vmem:[%s693_s1 + $0x1b0] sm:$0xff]  ;;  %v42_v40 = vld [vmem:[%s693_s1 + $0x28] sm:$0xff]  ;;  %v73_v42 = vld [vmem:[%s693_s1 + $0x120] sm:$0xff] }
  0x10   :  { %190 = vmatpush.msra.mxu3 %v94_v26  ;;  %171 = vmatpush.msra.mxu2 %v77_v27  ;;  %v59_v41 = vld [vmem:[%s693_s1 + $0xb0] sm:$0xff]  ;;  %v90_v43 = vld [vmem:[%s693_s1 + $0x1a8] sm:$0xff]  ;;  %v41_v44 = vld [vmem:[%s693_s1 + $0x20] sm:$0xff] }
  0x11   :  { %131 = vmatpush.msra.mxu0 %v45_v28  ;;  %150 = vmatpush.msra.mxu1 %v62_v29  ;;  %v58_v45 = vld [vmem:[%s693_s1 + $0xa8] sm:$0xff]  ;;  %v33_v46 = vld [vmem:[%s692_s0] sm:$0xff]  ;;  %v35_v49 = vld [vmem:[%s692_s0 + $0x10] sm:$0xff] }
  0x12   :  { %191 = vmatpush.msra.mxu3 %v93_v30  ;;  %172 = vmatpush.msra.mxu2 %v76_v31  ;;  %v34_v47 = vld [vmem:[%s692_s0 + $0x8] sm:$0xff]  ;;  %v89_v48 = vld [vmem:[%s693_s1 + $0x1a0] sm:$0xff]  ;;  %v36_v50 = vld [vmem:[%s692_s0 + $0x18] sm:$0xff]  ;;  %109 = vst [vmem:[#allocation1] ss:$4 sm:$0xff] %v33_v46 }
  0x13   :  { %132 = vmatpush.msra.mxu0 %v44_v32  ;;  %151 = vmatpush.msra.mxu1 %v61_v33  ;;  %v72_v51 = vld [vmem:[%s693_s1 + $0x118] sm:$0xff]  ;;  %v57_v53 = vld [vmem:[%s693_s1 + $0xa0] sm:$0xff]  ;;  %111 = vst [vmem:[#allocation1 + $0x1] ss:$4 sm:$0xff] %v34_v47  ;;  %v71_v54 = vld [vmem:[%s693_s1 + $0x110] sm:$0xff] }
  0x14   :  { %192 = vmatpush.msra.mxu3 %v92_v34  ;;  %173 = vmatpush.msra.mxu2 %v75_v35  ;;  %v40_v52 = vld [vmem:[%s693_s1 + $0x18] sm:$0xff]  ;;  %113 = vst [vmem:[#allocation1 + $0x2] ss:$4 sm:$0xff] %v35_v49  ;;  %v39_v56 = vld [vmem:[%s693_s1 + $0x10] sm:$0xff]  ;;  %v70_v59 = vld [vmem:[%s693_s1 + $0x108] sm:$0xff] }
  0x15   :  { %133 = vmatpush.msra.mxu0 %v43_v36  ;;  %152 = vmatpush.msra.mxu1 %v60_v37  ;;  %v88_v55 = vld [vmem:[%s693_s1 + $0x198] sm:$0xff]  ;;  %115 = vst [vmem:[#allocation1 + $0x3] ss:$4 sm:$0xff] %v36_v50  ;;  %v87_v58 = vld [vmem:[%s693_s1 + $0x190] sm:$0xff]  ;;  %v38_v60 = vld [vmem:[%s693_s1 + $0x8] sm:$0xff] }
  0x16   :  { %193 = vmatpush.msra.mxu3 %v91_v38  ;;  %174 = vmatpush.msra.mxu2 %v74_v39  ;;  %v56_v57 = vld [vmem:[%s693_s1 + $0x98] sm:$0xff]  ;;  %v55_v61 = vld [vmem:[%s693_s1 + $0x90] sm:$0xff]  ;;  %v86_v62 = vld [vmem:[%s693_s1 + $0x188] sm:$0xff] }
  0x17   :  { %134 = vmatpush.msra.mxu0 %v42_v40  ;;  %153 = vmatpush.msra.mxu1 %v59_v41  ;;  %v69_v63 = vld [vmem:[%s693_s1 + $0x100] sm:$0xff]  ;;  %v54_v1 = vld [vmem:[%s693_s1 + $0x88] sm:$0xff]  ;;  %v212_v4 = vld [vmem:[%s695_s3 + $0x38] sm:$0xff] }
  0x18   :  { %194 = vmatpush.msra.mxu3 %v90_v43  ;;  %175 = vmatpush.msra.mxu2 %v73_v42  ;;  %v37_v0 = vld [vmem:[%s693_s1] sm:$0xff]  ;;  %v211_v9 = vld [vmem:[%s695_s3 + $0x30] sm:$0xff]  ;;  %v210_v10 = vld [vmem:[%s695_s3 + $0x28] sm:$0xff] }
  0x19   :  { %135 = vmatpush.msra.mxu0 %v41_v44  ;;  %154 = vmatpush.msra.mxu1 %v58_v45  ;;  %v85_v2 = vld [vmem:[%s693_s1 + $0x180] sm:$0xff]  ;;  %v208_v12 = vld [vmem:[%s695_s3 + $0x18] sm:$0xff]  ;;  %v207_v13 = vld [vmem:[%s695_s3 + $0x10] sm:$0xff] }
  0x1a   :  { %195 = vmatpush.msra.mxu3 %v89_v48  ;;  %176 = vmatpush.msra.mxu2 %v72_v51  ;;  %v53_v3 = vld [vmem:[%s693_s1 + $0x80] sm:$0xff]  ;;  %v206_v14 = vld [vmem:[%s695_s3 + $0x8] sm:$0xff] }
  0x1b   :  { %136 = vmatpush.msra.mxu0 %v40_v52  ;;  %155 = vmatpush.msra.mxu1 %v57_v53  ;;  %v209_v11 = vld [vmem:[%s695_s3 + $0x20] sm:$0xff]  ;;  %v243_v16 = vld [vmem:[%s697_s5 + $0x8] sm:$0xff] }
  0x1c   :  { %196 = vmatpush.msra.mxu3 %v88_v55  ;;  %177 = vmatpush.msra.mxu2 %v71_v54  ;;  %v118_v5 = vld.sshfl [vmem:[#allocation1 + $0x10] sm:$0xff pattern:$0x73625140]  ;;  %v116_v6 = vld.sshfl [vmem:[#allocation1] sm:$0xff pattern:$0x73625140] }
  0x1d   :  { %137 = vmatpush.msra.mxu0 %v39_v56  ;;  %156 = vmatpush.msra.mxu1 %v56_v57  ;;  %v119_v7 = vld.sshfl [vmem:[#allocation1 + $0x18] sm:$0xff pattern:$0x73625140]  ;;  %v117_v8 = vld.sshfl [vmem:[#allocation1 + $0x8] sm:$0xff pattern:$0x73625140] }
  0x1e   :  { %197 = vmatpush.msra.mxu3 %v87_v58  ;;  %178 = vmatpush.msra.mxu2 %v70_v59  ;;  %v205_v15 = vld [vmem:[%s695_s3] sm:$0xff] }
  0x1f   :  { %138 = vmatpush.msra.mxu0 %v38_v60  ;;  %157 = vmatpush.msra.mxu1 %v55_v61  ;;  %v353_v17 = vld [vmem:[%s694_s2] ss:$0 sm:$0xff] }
  0x20   :  { %198 = vmatpush.msra.mxu3 %v86_v62  ;;  %179 = vmatpush.msra.mxu2 %v69_v63  ;;  %v242_v27 = vld [vmem:[%s697_s5] sm:$0xff] }
  0x21   :  { %139 = vmatpush.msra.mxu0 %v37_v0  ;;  %180 = vmatmul.f32.vlgmr.msra.gmra.mxu2 %v118_v5  ;;  %v273_v28 = vld [vmem:[%s699_s7] sm:$0xf] }
  0x22   :  { %158 = vmatpush.msra.mxu1 %v54_v1  ;;  %199 = vmatpush.msra.mxu3 %v85_v2  ;;  %v354_v29 = vld [vmem:[%s696_s4] ss:$0 sm:$0xff] }
  0x23   :  { %140 = vmatmul.f32.vlgmr.msra.gmra.mxu0 %v116_v6  ;;  %200 = vmatmul.f32.vlgmr.msra.gmra.mxu3 %v119_v7  ;;  %v355_v33 = vld [vmem:[%s698_s6] ss:$0 sm:$0xff] }
  0x24   :  { %159 = vmatpush.msra.mxu1 %v53_v3  ;;  %229 = vmatpush.msrb.mxu0 %v212_v4  ;;  %v356_v37 = vld [vmem:[%s700_s8] ss:$0 sm:$0xff] }
  0x25   :  { %160 = vmatmul.f32.vlgmr.msra.gmra.mxu1 %v117_v8  ;;  %347 = vmatpush.msk.msrb.mxu2 %vm282_vm1, %v273_v28 }
  0x26   :  { %230 = vmatpush.msrb.mxu0 %v211_v9  ;;  %266 = vmatpush.msrb.mxu1 %v243_v16 }
  0x28   :  { %231 = vmatpush.msrb.mxu0 %v210_v10  ;;  %267 = vmatpush.msrb.mxu1 %v242_v27 }
  0x2a   :  { %232 = vmatpush.msrb.mxu0 %v209_v11 }
  0x2c   :  { %233 = vmatpush.msrb.mxu0 %v208_v12 }
  0x2e   :  { %234 = vmatpush.msrb.mxu0 %v207_v13 }
  0x30   :  { %235 = vmatpush.msrb.mxu0 %v206_v14 }
  0x32   :  { %236 = vmatpush.msrb.mxu0 %v205_v15 }
  0xa0   :  { %v141_v18 = vpop.f32.mrf.mxu0 }
  0xa1   :  { %v142_v19 = vadd.f32 %v353_v17, %v141_v18 }
  0xa2   :  { %v161_v20 = vpop.f32.mrf.mxu1 }
  0xa3   :  { %v162_v21 = vadd.f32 %v161_v20, %v142_v19 }
  0xa4   :  { %v181_v22 = vpop.f32.mrf.mxu2 }
  0xa5   :  { %v182_v23 = vadd.f32 %v181_v22, %v162_v21 }
  0xa6   :  { %v201_v24 = vpop.f32.mrf.mxu3 }
  0xa7   :  { %v202_v25 = vadd.f32 %v201_v24, %v182_v23 }
  0xa9   :  { %v204_v26 = vmax.f32 %v202_v25, 0.0 }
  0xab   :  { %345 = vmatmul.msk.f32.vlgmr.msrb.gmra.mxu0 %vm217_vm0, %v204_v26 }
 0x128   :  { %v238_v30 = vpop.f32.mrf.mxu0 }
 0x129   :  { %v239_v31 = vadd.f32 %v354_v29, %v238_v30 }
 0x12b   :  { %v241_v32 = vmax.f32 %v239_v31, 0.0 }
 0x12d   :  { %346 = vmatmul.msk.f32.vlgmr.msrb.gmra.mxu1 %vm248_vm2, %v241_v32 }
 0x1aa   :  { %v269_v34 = vpop.f32.mrf.mxu1 }
 0x1ab   :  { %v270_v35 = vadd.f32 %v355_v33, %v269_v34 }
 0x1ad   :  { %v272_v36 = vmax.f32 %v270_v35, 0.0 }
 0x1af   :  { %348 = vmatmul.msk.f32.vlgmr.msrb.gmra.mxu2 %vm278_vm3, %v272_v36 }
 0x232   :  { %v303_v38 = vpop.f32.mrf.mxu2 }
 0x233   :  { %v304_v39 = vadd.f32 %v356_v37, %v303_v38 }
 0x235   :  { %v349_v40 = vmul.f32 -1.442695, %v304_v39 }
 0x237   :  { %357 = vpow2.f32 %v349_v40 }
 0x23d   :  { %v358_v41 = vpop.eup %357 }
 0x23e   :  { %v309_v42 = vadd.f32 1.0, %v358_v41 }
 0x240   :  { %359 = vrcp.f32 %v309_v42  ;;  %v321_v46 = vand.u32 2147483648, %v309_v42  ;;  %v319_v48 = vand.u32 2147483647, %v309_v42  ;;  %vm315_vm5 = vweird.f32 %v309_v42 }
 0x242   :  { %v322_v50 = vor.u32 1.1754944e-38, %v321_v46  ;;  %vm320_vm8 = vcmp.eq.f32.partialorder %v319_v48, 8.507059e+37 }
 0x246   :  { %v360_v43 = vpop.eup %359 }
 0x247   :  { %v311_v44 = vmul.f32 %v360_v43, %v309_v42  ;;  %vm316_vm4 = vweird.f32 %v360_v43 }
 0x248   :  { %vm317_vm6 = vmor %vm315_vm5, %vm316_vm4 }
 0x249   :  { %v312_v45 = vsub.f32 1.0, %v311_v44 }
 0x24b   :  { %v313_v47 = vmul.f32 %v360_v43, %v312_v45 }
 0x24d   :  { %v314_v49 = vadd.f32 %v360_v43, %v313_v47 }
 0x24f   :  { %v318_v51 = vsel %vm317_vm6, %v360_v43, %v314_v49 }
 0x250   :  { %v323_v52 = vsel %vm320_vm8, %v322_v50, %v318_v51 }
 0x251   :  { %326 = vst.msk [vmem:[#allocation2] sm:$0xff] %vm325_vm7, %v323_v52 }
 0x252   :  { %330 = vsyncadd [#allocation3], 96  ;;  %s333_s8 = sshll.u32 %s701_s9, 4  ;;  %s387_s20 = smov [#allocation2]   ;;  %s334_s8 = int_to_ptr.hbm [resolvable:$true] %s333_s8 }
 0x253   :  { %s331_s1 = sshll.u32 %s387_s20, 4  ;;  %s388_s21 = smov 32   ;;  %s332_s1 = int_to_ptr.vmem [resolvable:$true] %s331_s1 }
 0x254   :  { %s389_s22 = smov 2  }
 0x255   :  { %339 = dma.vmem_to_hbm [thread:$0]  %s332_s1, 32, %s334_s8, [#allocation3], %s388_s21, %s388_s21, %s389_s22  }
 0x256   :  { %385 = dma.done.wait [#allocation3], 128  }
 0x257   :  { %386 = vsyncadd [#allocation3], 4294967168 }
 0x258   :  { %344 = vsyncpa [#allocation3], 1 }

</bundles_post_ra>
